<compile_context>
chip_gen: v5e
topology: v5e:2x2
jax: 0.10.0
libtpu: 0.0.40
codegen_flags: <defaults>
</compile_context>

<pallas_src>
import numpy as np
import jax
import jax.numpy as jnp
from jax import lax
from jax.experimental import pallas as pl
from jax.experimental.pallas import tpu as pltpu


def _bilstm_recurrence_kernel(gx_ref, whh_ref, hout_ref, h_sc, c_sc):
    # gx_ref  : [t_chunk, Bp, 8H] bf16  precomputed x@W_ih + b, both dirs fused,
    #           backward half already time-reversed (aligned with forward index)
    # whh_ref : [2H, 8H] bf16           block-diagonal fused hidden->gate weights
    # hout_ref: [Bp, 2H] f32            [h_fwd_final | h_bwd_final]
    # h_sc/c_sc: [Bp, 2H] f32 VMEM scratch, carried across the T-chunk grid axis
    tc = pl.program_id(0)

    @pl.when(tc == 0)
    def _():
        h_sc[...] = jnp.zeros_like(h_sc)
        c_sc[...] = jnp.zeros_like(c_sc)

    t_chunk, Bp, G = gx_ref.shape
    H2 = h_sc.shape[-1]  # 2H

    whh = whh_ref[...]  # [2H, 8H] bf16, hoisted out of the loop

    # Hoisted constants: the tanh (g) gate occupies lane columns [4H, 6H).
    lane = lax.broadcasted_iota(jnp.int32, (Bp, G), 1)
    g_mask = (lane >= 2 * H2) & (lane < 3 * H2)
    # sigmoid(x) = 0.5*tanh(0.5*x) + 0.5  ->  one full-width EUP tanh pass
    # per step instead of separate tanh + sigmoid (exp + recip) passes.
    pre_scale = jnp.where(g_mask, jnp.float32(1.0), jnp.float32(0.5))

    def step(t, carry):
        # Serial critical path: one bf16 MXU matmul + elementwise gate update.
        gates = gx_ref[t].astype(jnp.float32) + jnp.dot(
            h_sc[...].astype(jnp.bfloat16), whh,
            preferred_element_type=jnp.float32)               # [Bp, 8H]
        th = jnp.tanh(gates * pre_scale)                      # single EUP pass
        act = jnp.where(g_mask, th, 0.5 * th + 0.5)           # VPU select/fma
        i_a = act[:, 0 * H2:1 * H2]
        f_a = act[:, 1 * H2:2 * H2]
        g_a = act[:, 2 * H2:3 * H2]
        o_a = act[:, 3 * H2:4 * H2]
        c_new = f_a * c_sc[...] + i_a * g_a
        h_new = o_a * jnp.tanh(c_new)
        c_sc[...] = c_new
        h_sc[...] = h_new
        return carry

    lax.fori_loop(0, t_chunk, step, 0, unroll=True)

    @pl.when(tc == pl.num_programs(0) - 1)
    def _():
        hout_ref[...] = h_sc[...]


def _largest_divisor_leq(n, cap):
    c = min(n, cap)
    while n % c:
        c -= 1
    return c


def bilstm_encoder(text_emb, w_ih, w_hh, b_ih, b_hh, *, t_chunk_cap=64):
    """
    text_emb : [B, T, E]   (same input as the PyTorch module)
    w_ih     : [2, 4H, E]  (dir 0 = forward, dir 1 = reverse; PyTorch gate order i,f,g,o)
    w_hh     : [2, 4H, H]
    b_ih/b_hh: [2, 4H]
    returns  : [B, 2H] == torch.cat((hidden[-2], hidden[-1]), dim=1)
    """
    B, T, E = text_emb.shape
    H4 = w_ih.shape[1]
    H = H4 // 4
    H2 = 2 * H
    G = 8 * H  # fused gate width (both directions)
    f32 = jnp.float32

    x = jnp.transpose(text_emb, (1, 0, 2)).astype(f32)          # [T, B, E] time-major

    # ---- input projection for both directions, hoisted out of the recurrence ----
    wih_t = jnp.transpose(w_ih, (0, 2, 1)).astype(f32)          # [2, E, 4H]
    bias = (b_ih + b_hh).astype(f32)                            # [2, 4H]
    gx_fwd = jnp.einsum("tbe,eg->tbg", x, wih_t[0]) + bias[0]        # [T, B, 4H]
    gx_bwd = jnp.einsum("tbe,eg->tbg", x[::-1], wih_t[1]) + bias[1]  # time-aligned w/ fwd
    # Fuse into gate-major layout: col = gate*2H + dir*H + h
    gx = jnp.stack([gx_fwd.reshape(T, B, 4, H),
                    gx_bwd.reshape(T, B, 4, H)], axis=3)        # [T, B, 4, 2, H]
    gx = gx.reshape(T, B, G)

    # Pad batch up to 8 sublanes (free MXU/vreg rows).
    Bp = max(8, -(-B // 8) * 8)
    if Bp != B:
        gx = jnp.pad(gx, ((0, 0), (0, Bp - B), (0, 0)))
    gx = gx.astype(jnp.bfloat16)                                # halve DMA bytes

    # ---- block-diagonal fused hidden->gate weights, same gate-major layout ----
    whh_t = jnp.transpose(w_hh, (0, 2, 1)).reshape(2, H, 4, H).astype(f32)
    whh_blk = jnp.zeros((2, H, 4, 2, H), f32)
    whh_blk = whh_blk.at[0, :, :, 0, :].set(whh_t[0])           # fwd state -> fwd gates
    whh_blk = whh_blk.at[1, :, :, 1, :].set(whh_t[1])           # bwd state -> bwd gates
    whh_blk = whh_blk.reshape(H2, G).astype(jnp.bfloat16)       # [2H, 8H]

    # Tile T so realistic shapes never stage the whole sequence in VMEM
    # (important on v7x's 64 MiB VMEM); h/c carry across the grid in scratch.
    t_chunk = _largest_divisor_leq(T, t_chunk_cap)
    n_chunks = T // t_chunk

    h_last = pl.pallas_call(
        _bilstm_recurrence_kernel,
        out_shape=jax.ShapeDtypeStruct((Bp, H2), f32),
        grid_spec=pltpu.PrefetchScalarGridSpec(
            num_scalar_prefetch=0,
            grid=(n_chunks,),
            in_specs=[
                pl.BlockSpec((t_chunk, Bp, G), lambda c: (c, 0, 0)),
                pl.BlockSpec((H2, G), lambda c: (0, 0)),
            ],
            out_specs=pl.BlockSpec((Bp, H2), lambda c: (0, 0)),
            scratch_shapes=[
                pltpu.VMEM((Bp, H2), f32),   # h state
                pltpu.VMEM((Bp, H2), f32),   # c state
            ],
        ),
        compiler_params=pltpu.CompilerParams(
            # Serial recurrence over T chunks (state carried in scratch).
            dimension_semantics=("arbitrary",)),
    )(gx, whh_blk)

    return h_last[:B]   # [B, 2H] == [h_fwd_final | h_bwd_final]


def _lstm_dir_ref(x, w_ih, w_hh, b_ih, b_hh, reverse):
    """Pure-JAX f32 reference for one LSTM direction (PyTorch semantics)."""
    T, B, _ = x.shape
    H = w_hh.shape[1]
    h = jnp.zeros((B, H), jnp.float32)
    c = jnp.zeros((B, H), jnp.float32)
    order = range(T - 1, -1, -1) if reverse else range(T)
    for t in order:
        gates = x[t] @ w_ih.T + h @ w_hh.T + b_ih + b_hh
        i = jax.nn.sigmoid(gates[:, :H])
        f = jax.nn.sigmoid(gates[:, H:2 * H])
        g = jnp.tanh(gates[:, 2 * H:3 * H])
        o = jax.nn.sigmoid(gates[:, 3 * H:])
        c = f * c + i * g
        h = o * jnp.tanh(c)
    return h


if __name__ == "__main__":
    B, T, E, H = 2, 8, 16, 32        # batch, pad_seq_len, emb_dim, hidden_size
    key = jax.random.PRNGKey(0)
    k = jax.random.split(key, 5)

    # nn.LSTM-style uniform(-1/sqrt(H), 1/sqrt(H)) parameters.
    bound = 1.0 / (H ** 0.5)
    text_emb = jax.random.normal(k[0], (B, T, E), jnp.float32)
    w_ih = jax.random.uniform(k[1], (2, 4 * H, E), jnp.float32, -bound, bound)
    w_hh = jax.random.uniform(k[2], (2, 4 * H, H), jnp.float32, -bound, bound)
    b_ih = jax.random.uniform(k[3], (2, 4 * H), jnp.float32, -bound, bound)
    b_hh = jax.random.uniform(k[4], (2, 4 * H), jnp.float32, -bound, bound)

    out = bilstm_encoder(text_emb, w_ih, w_hh, b_ih, b_hh)
    out = jax.block_until_ready(out)
    assert out.shape == (B, 2 * H)

    # Correctness check against a pure-JAX f32 reference of the PyTorch forward.
    x_tm = jnp.transpose(text_emb, (1, 0, 2))
    h_f = _lstm_dir_ref(x_tm, w_ih[0], w_hh[0], b_ih[0], b_hh[0], reverse=False)
    h_b = _lstm_dir_ref(x_tm, w_ih[1], w_hh[1], b_ih[1], b_hh[1], reverse=True)
    ref = jnp.concatenate([h_f, h_b], axis=1)
    np.testing.assert_allclose(np.asarray(out), np.asarray(ref), rtol=2e-2, atol=2e-2)

    print("KERNEL_OK")
</pallas_src>

<mosaic_0001>
module attributes {stable_mosaic.version = 11 : i64} {
  func.func @_bilstm_recurrence_kernel(%arg0: i32, %arg1: memref<8x8x256xbf16, #tpu.memory_space<vmem>>, %arg2: memref<64x256xbf16, #tpu.memory_space<vmem>>, %arg3: memref<8x64xf32, #tpu.memory_space<vmem>>, %arg4: memref<8x64xf32, #tpu.memory_space<vmem>>, %arg5: memref<8x64xf32, #tpu.memory_space<vmem>>) attributes {dimension_semantics = [#tpu.dimension_semantics<arbitrary>], iteration_bounds = array<i64: 1>, scalar_prefetch = 0 : i64, scratch_operands = 2 : i64, tpu.core_type = #tpu.core_type<tc>, window_params = [{transform_indices = @transform_0, window_bounds = array<i64: 8, 8, 256>}, {pipeline_mode = #tpu.pipeline_mode<synchronous>, transform_indices = @transform_1, window_bounds = array<i64: 64, 256>}, {pipeline_mode = #tpu.pipeline_mode<synchronous>, transform_indices = @transform_2, window_bounds = array<i64: 8, 64>}]} {
    %c0_i32 = arith.constant 0 : i32
    %0 = arith.cmpi eq, %arg0, %c0_i32 : i32
    %1 = arith.extui %0 : i1 to i32
    %c0_i32_0 = arith.constant 0 : i32
    %2 = arith.cmpi ne, %1, %c0_i32_0 : i32
    scf.if %2 {
      %cst_110 = arith.constant 0.000000e+00 : f32
      %232 = vector.broadcast %cst_110 : f32 to vector<8x64xf32>
      %c0_111 = arith.constant 0 : index
      %c0_112 = arith.constant 0 : index
      %233 = vector.load %arg4[%c0_111, %c0_112] : memref<8x64xf32, #tpu.memory_space<vmem>>, vector<8x64xf32>
      tpu.vector_store %arg4[%c0_111, %c0_112], %232 {strides = array<i32>} : memref<8x64xf32, #tpu.memory_space<vmem>>, vector<8x64xf32>,
      %cst_113 = arith.constant 0.000000e+00 : f32
      %234 = vector.broadcast %cst_113 : f32 to vector<8x64xf32>
      %c0_114 = arith.constant 0 : index
      %c0_115 = arith.constant 0 : index
      %235 = vector.load %arg5[%c0_114, %c0_115] : memref<8x64xf32, #tpu.memory_space<vmem>>, vector<8x64xf32>
      tpu.vector_store %arg5[%c0_114, %c0_115], %234 {strides = array<i32>} : memref<8x64xf32, #tpu.memory_space<vmem>>, vector<8x64xf32>,
    } else {
    }
    %c0 = arith.constant 0 : index
    %c0_1 = arith.constant 0 : index
    %3 = vector.load %arg2[%c0, %c0_1] : memref<64x256xbf16, #tpu.memory_space<vmem>>, vector<64x256xbf16>
    %4 = tpu.iota {dimensions = array<i32: 1>} : vector<8x256xi32>
    %c128_i32 = arith.constant 128 : i32
    %5 = vector.broadcast %c128_i32 : i32 to vector<8x256xi32>
    %6 = arith.cmpi sge, %4, %5 : vector<8x256xi32>
    %c192_i32 = arith.constant 192 : i32
    %7 = vector.broadcast %c192_i32 : i32 to vector<8x256xi32>
    %8 = arith.cmpi slt, %4, %7 : vector<8x256xi32>
    %9 = arith.andi %6, %8 : vector<8x256xi1>
    %cst = arith.constant 1.000000e+00 : f32
    %cst_2 = arith.constant 5.000000e-01 : f32
    %10 = vector.broadcast %cst : f32 to vector<8x256xf32>
    %11 = vector.broadcast %cst_2 : f32 to vector<8x256xf32>
    %12 = arith.select %9, %10, %11 : vector<8x256xi1>, vector<8x256xf32>
    %c0_i32_3 = arith.constant 0 : i32
    %13 = arith.index_cast %c0_i32_3 : i32 to index
    %c0_4 = arith.constant 0 : index
    %c0_5 = arith.constant 0 : index
    %14 = vector.load %arg1[%13, %c0_4, %c0_5] : memref<8x8x256xbf16, #tpu.memory_space<vmem>>, vector<1x8x256xbf16>
    %15 = vector.shape_cast %14 : vector<1x8x256xbf16> to vector<8x256xbf16>
    %16 = arith.extf %15 : vector<8x256xbf16> to vector<8x256xf32>
    %c0_6 = arith.constant 0 : index
    %c0_7 = arith.constant 0 : index
    %17 = vector.load %arg4[%c0_6, %c0_7] : memref<8x64xf32, #tpu.memory_space<vmem>>, vector<8x64xf32>
    %18 = arith.truncf %17 : vector<8x64xf32> to vector<8x64xbf16>
    %cst_8 = arith.constant dense<0.000000e+00> : vector<8x256xf32>
    %19 = tpu.matmul %18, %3, %cst_8 {dimension_numbers = #tpu.dot_dimension_numbers<[1], [0], [0], [1], [0, 0, 1, 1], [], []>} : vector<8x64xbf16>, vector<64x256xbf16>, vector<8x256xf32> -> vector<8x256xf32>
    %20 = arith.addf %16, %19 : vector<8x256xf32>
    %21 = arith.mulf %20, %12 : vector<8x256xf32>
    %22 = math.tanh %21 : vector<8x256xf32>
    %cst_9 = arith.constant 5.000000e-01 : f32
    %23 = vector.broadcast %cst_9 : f32 to vector<8x256xf32>
    %24 = arith.mulf %23, %22 : vector<8x256xf32>
    %cst_10 = arith.constant 5.000000e-01 : f32
    %25 = vector.broadcast %cst_10 : f32 to vector<8x256xf32>
    %26 = arith.addf %24, %25 : vector<8x256xf32>
    %27 = arith.select %9, %22, %26 : vector<8x256xi1>, vector<8x256xf32>
    %28 = vector.extract_strided_slice %27 {offsets = [0, 0], sizes = [8, 64], strides = [1, 1]} : vector<8x256xf32> to vector<8x64xf32>
    %29 = vector.extract_strided_slice %27 {offsets = [0, 64], sizes = [8, 64], strides = [1, 1]} : vector<8x256xf32> to vector<8x64xf32>
    %30 = vector.extract_strided_slice %27 {offsets = [0, 128], sizes = [8, 64], strides = [1, 1]} : vector<8x256xf32> to vector<8x64xf32>
    %31 = vector.extract_strided_slice %27 {offsets = [0, 192], sizes = [8, 64], strides = [1, 1]} : vector<8x256xf32> to vector<8x64xf32>
    %c0_11 = arith.constant 0 : index
    %c0_12 = arith.constant 0 : index
    %32 = vector.load %arg5[%c0_11, %c0_12] : memref<8x64xf32, #tpu.memory_space<vmem>>, vector<8x64xf32>
    %33 = arith.mulf %29, %32 : vector<8x64xf32>
    %34 = arith.mulf %28, %30 : vector<8x64xf32>
    %35 = arith.addf %33, %34 : vector<8x64xf32>
    %36 = math.tanh %35 : vector<8x64xf32>
    %37 = arith.mulf %31, %36 : vector<8x64xf32>
    %c0_13 = arith.constant 0 : index
    %c0_14 = arith.constant 0 : index
    %38 = vector.load %arg5[%c0_13, %c0_14] : memref<8x64xf32, #tpu.memory_space<vmem>>, vector<8x64xf32>
    tpu.vector_store %arg5[%c0_13, %c0_14], %35 {strides = array<i32>} : memref<8x64xf32, #tpu.memory_space<vmem>>, vector<8x64xf32>,
    %c0_15 = arith.constant 0 : index
    %c0_16 = arith.constant 0 : index
    %39 = vector.load %arg4[%c0_15, %c0_16] : memref<8x64xf32, #tpu.memory_space<vmem>>, vector<8x64xf32>
    tpu.vector_store %arg4[%c0_15, %c0_16], %37 {strides = array<i32>} : memref<8x64xf32, #tpu.memory_space<vmem>>, vector<8x64xf32>,
    %c1_i32 = arith.constant 1 : i32
    %40 = arith.index_cast %c1_i32 : i32 to index
    %c0_17 = arith.constant 0 : index
    %c0_18 = arith.constant 0 : index
    %41 = vector.load %arg1[%40, %c0_17, %c0_18] : memref<8x8x256xbf16, #tpu.memory_space<vmem>>, vector<1x8x256xbf16>
    %42 = vector.shape_cast %41 : vector<1x8x256xbf16> to vector<8x256xbf16>
    %43 = arith.extf %42 : vector<8x256xbf16> to vector<8x256xf32>
    %c0_19 = arith.constant 0 : index
    %c0_20 = arith.constant 0 : index
    %44 = vector.load %arg4[%c0_19, %c0_20] : memref<8x64xf32, #tpu.memory_space<vmem>>, vector<8x64xf32>
    %45 = arith.truncf %44 : vector<8x64xf32> to vector<8x64xbf16>
    %cst_21 = arith.constant dense<0.000000e+00> : vector<8x256xf32>
    %46 = tpu.matmul %45, %3, %cst_21 {dimension_numbers = #tpu.dot_dimension_numbers<[1], [0], [0], [1], [0, 0, 1, 1], [], []>} : vector<8x64xbf16>, vector<64x256xbf16>, vector<8x256xf32> -> vector<8x256xf32>
    %47 = arith.addf %43, %46 : vector<8x256xf32>
    %48 = arith.mulf %47, %12 : vector<8x256xf32>
    %49 = math.tanh %48 : vector<8x256xf32>
    %cst_22 = arith.constant 5.000000e-01 : f32
    %50 = vector.broadcast %cst_22 : f32 to vector<8x256xf32>
    %51 = arith.mulf %50, %49 : vector<8x256xf32>
    %cst_23 = arith.constant 5.000000e-01 : f32
    %52 = vector.broadcast %cst_23 : f32 to vector<8x256xf32>
    %53 = arith.addf %51, %52 : vector<8x256xf32>
    %54 = arith.select %9, %49, %53 : vector<8x256xi1>, vector<8x256xf32>
    %55 = vector.extract_strided_slice %54 {offsets = [0, 0], sizes = [8, 64], strides = [1, 1]} : vector<8x256xf32> to vector<8x64xf32>
    %56 = vector.extract_strided_slice %54 {offsets = [0, 64], sizes = [8, 64], strides = [1, 1]} : vector<8x256xf32> to vector<8x64xf32>
    %57 = vector.extract_strided_slice %54 {offsets = [0, 128], sizes = [8, 64], strides = [1, 1]} : vector<8x256xf32> to vector<8x64xf32>
    %58 = vector.extract_strided_slice %54 {offsets = [0, 192], sizes = [8, 64], strides = [1, 1]} : vector<8x256xf32> to vector<8x64xf32>
    %c0_24 = arith.constant 0 : index
    %c0_25 = arith.constant 0 : index
    %59 = vector.load %arg5[%c0_24, %c0_25] : memref<8x64xf32, #tpu.memory_space<vmem>>, vector<8x64xf32>
    %60 = arith.mulf %56, %59 : vector<8x64xf32>
    %61 = arith.mulf %55, %57 : vector<8x64xf32>
    %62 = arith.addf %60, %61 : vector<8x64xf32>
    %63 = math.tanh %62 : vector<8x64xf32>
    %64 = arith.mulf %58, %63 : vector<8x64xf32>
    %c0_26 = arith.constant 0 : index
    %c0_27 = arith.constant 0 : index
    %65 = vector.load %arg5[%c0_26, %c0_27] : memref<8x64xf32, #tpu.memory_space<vmem>>, vector<8x64xf32>
    tpu.vector_store %arg5[%c0_26, %c0_27], %62 {strides = array<i32>} : memref<8x64xf32, #tpu.memory_space<vmem>>, vector<8x64xf32>,
    %c0_28 = arith.constant 0 : index
    %c0_29 = arith.constant 0 : index
    %66 = vector.load %arg4[%c0_28, %c0_29] : memref<8x64xf32, #tpu.memory_space<vmem>>, vector<8x64xf32>
    tpu.vector_store %arg4[%c0_28, %c0_29], %64 {strides = array<i32>} : memref<8x64xf32, #tpu.memory_space<vmem>>, vector<8x64xf32>,
    %c2_i32 = arith.constant 2 : i32
    %67 = arith.index_cast %c2_i32 : i32 to index
    %c0_30 = arith.constant 0 : index
    %c0_31 = arith.constant 0 : index
    %68 = vector.load %arg1[%67, %c0_30, %c0_31] : memref<8x8x256xbf16, #tpu.memory_space<vmem>>, vector<1x8x256xbf16>
    %69 = vector.shape_cast %68 : vector<1x8x256xbf16> to vector<8x256xbf16>
    %70 = arith.extf %69 : vector<8x256xbf16> to vector<8x256xf32>
    %c0_32 = arith.constant 0 : index
    %c0_33 = arith.constant 0 : index
    %71 = vector.load %arg4[%c0_32, %c0_33] : memref<8x64xf32, #tpu.memory_space<vmem>>, vector<8x64xf32>
    %72 = arith.truncf %71 : vector<8x64xf32> to vector<8x64xbf16>
    %cst_34 = arith.constant dense<0.000000e+00> : vector<8x256xf32>
    %73 = tpu.matmul %72, %3, %cst_34 {dimension_numbers = #tpu.dot_dimension_numbers<[1], [0], [0], [1], [0, 0, 1, 1], [], []>} : vector<8x64xbf16>, vector<64x256xbf16>, vector<8x256xf32> -> vector<8x256xf32>
    %74 = arith.addf %70, %73 : vector<8x256xf32>
    %75 = arith.mulf %74, %12 : vector<8x256xf32>
    %76 = math.tanh %75 : vector<8x256xf32>
    %cst_35 = arith.constant 5.000000e-01 : f32
    %77 = vector.broadcast %cst_35 : f32 to vector<8x256xf32>
    %78 = arith.mulf %77, %76 : vector<8x256xf32>
    %cst_36 = arith.constant 5.000000e-01 : f32
    %79 = vector.broadcast %cst_36 : f32 to vector<8x256xf32>
    %80 = arith.addf %78, %79 : vector<8x256xf32>
    %81 = arith.select %9, %76, %80 : vector<8x256xi1>, vector<8x256xf32>
    %82 = vector.extract_strided_slice %81 {offsets = [0, 0], sizes = [8, 64], strides = [1, 1]} : vector<8x256xf32> to vector<8x64xf32>
    %83 = vector.extract_strided_slice %81 {offsets = [0, 64], sizes = [8, 64], strides = [1, 1]} : vector<8x256xf32> to vector<8x64xf32>
    %84 = vector.extract_strided_slice %81 {offsets = [0, 128], sizes = [8, 64], strides = [1, 1]} : vector<8x256xf32> to vector<8x64xf32>
    %85 = vector.extract_strided_slice %81 {offsets = [0, 192], sizes = [8, 64], strides = [1, 1]} : vector<8x256xf32> to vector<8x64xf32>
    %c0_37 = arith.constant 0 : index
    %c0_38 = arith.constant 0 : index
    %86 = vector.load %arg5[%c0_37, %c0_38] : memref<8x64xf32, #tpu.memory_space<vmem>>, vector<8x64xf32>
    %87 = arith.mulf %83, %86 : vector<8x64xf32>
    %88 = arith.mulf %82, %84 : vector<8x64xf32>
    %89 = arith.addf %87, %88 : vector<8x64xf32>
    %90 = math.tanh %89 : vector<8x64xf32>
    %91 = arith.mulf %85, %90 : vector<8x64xf32>
    %c0_39 = arith.constant 0 : index
    %c0_40 = arith.constant 0 : index
    %92 = vector.load %arg5[%c0_39, %c0_40] : memref<8x64xf32, #tpu.memory_space<vmem>>, vector<8x64xf32>
    tpu.vector_store %arg5[%c0_39, %c0_40], %89 {strides = array<i32>} : memref<8x64xf32, #tpu.memory_space<vmem>>, vector<8x64xf32>,
    %c0_41 = arith.constant 0 : index
    %c0_42 = arith.constant 0 : index
    %93 = vector.load %arg4[%c0_41, %c0_42] : memref<8x64xf32, #tpu.memory_space<vmem>>, vector<8x64xf32>
    tpu.vector_store %arg4[%c0_41, %c0_42], %91 {strides = array<i32>} : memref<8x64xf32, #tpu.memory_space<vmem>>, vector<8x64xf32>,
    %c3_i32 = arith.constant 3 : i32
    %94 = arith.index_cast %c3_i32 : i32 to index
    %c0_43 = arith.constant 0 : index
    %c0_44 = arith.constant 0 : index
    %95 = vector.load %arg1[%94, %c0_43, %c0_44] : memref<8x8x256xbf16, #tpu.memory_space<vmem>>, vector<1x8x256xbf16>
    %96 = vector.shape_cast %95 : vector<1x8x256xbf16> to vector<8x256xbf16>
    %97 = arith.extf %96 : vector<8x256xbf16> to vector<8x256xf32>
    %c0_45 = arith.constant 0 : index
    %c0_46 = arith.constant 0 : index
    %98 = vector.load %arg4[%c0_45, %c0_46] : memref<8x64xf32, #tpu.memory_space<vmem>>, vector<8x64xf32>
    %99 = arith.truncf %98 : vector<8x64xf32> to vector<8x64xbf16>
    %cst_47 = arith.constant dense<0.000000e+00> : vector<8x256xf32>
    %100 = tpu.matmul %99, %3, %cst_47 {dimension_numbers = #tpu.dot_dimension_numbers<[1], [0], [0], [1], [0, 0, 1, 1], [], []>} : vector<8x64xbf16>, vector<64x256xbf16>, vector<8x256xf32> -> vector<8x256xf32>
    %101 = arith.addf %97, %100 : vector<8x256xf32>
    %102 = arith.mulf %101, %12 : vector<8x256xf32>
    %103 = math.tanh %102 : vector<8x256xf32>
    %cst_48 = arith.constant 5.000000e-01 : f32
    %104 = vector.broadcast %cst_48 : f32 to vector<8x256xf32>
    %105 = arith.mulf %104, %103 : vector<8x256xf32>
    %cst_49 = arith.constant 5.000000e-01 : f32
    %106 = vector.broadcast %cst_49 : f32 to vector<8x256xf32>
    %107 = arith.addf %105, %106 : vector<8x256xf32>
    %108 = arith.select %9, %103, %107 : vector<8x256xi1>, vector<8x256xf32>
    %109 = vector.extract_strided_slice %108 {offsets = [0, 0], sizes = [8, 64], strides = [1, 1]} : vector<8x256xf32> to vector<8x64xf32>
    %110 = vector.extract_strided_slice %108 {offsets = [0, 64], sizes = [8, 64], strides = [1, 1]} : vector<8x256xf32> to vector<8x64xf32>
    %111 = vector.extract_strided_slice %108 {offsets = [0, 128], sizes = [8, 64], strides = [1, 1]} : vector<8x256xf32> to vector<8x64xf32>
    %112 = vector.extract_strided_slice %108 {offsets = [0, 192], sizes = [8, 64], strides = [1, 1]} : vector<8x256xf32> to vector<8x64xf32>
    %c0_50 = arith.constant 0 : index
    %c0_51 = arith.constant 0 : index
    %113 = vector.load %arg5[%c0_50, %c0_51] : memref<8x64xf32, #tpu.memory_space<vmem>>, vector<8x64xf32>
    %114 = arith.mulf %110, %113 : vector<8x64xf32>
    %115 = arith.mulf %109, %111 : vector<8x64xf32>
    %116 = arith.addf %114, %115 : vector<8x64xf32>
    %117 = math.tanh %116 : vector<8x64xf32>
    %118 = arith.mulf %112, %117 : vector<8x64xf32>
    %c0_52 = arith.constant 0 : index
    %c0_53 = arith.constant 0 : index
    %119 = vector.load %arg5[%c0_52, %c0_53] : memref<8x64xf32, #tpu.memory_space<vmem>>, vector<8x64xf32>
    tpu.vector_store %arg5[%c0_52, %c0_53], %116 {strides = array<i32>} : memref<8x64xf32, #tpu.memory_space<vmem>>, vector<8x64xf32>,
    %c0_54 = arith.constant 0 : index
    %c0_55 = arith.constant 0 : index
    %120 = vector.load %arg4[%c0_54, %c0_55] : memref<8x64xf32, #tpu.memory_space<vmem>>, vector<8x64xf32>
    tpu.vector_store %arg4[%c0_54, %c0_55], %118 {strides = array<i32>} : memref<8x64xf32, #tpu.memory_space<vmem>>, vector<8x64xf32>,
    %c4_i32 = arith.constant 4 : i32
    %121 = arith.index_cast %c4_i32 : i32 to index
    %c0_56 = arith.constant 0 : index
    %c0_57 = arith.constant 0 : index
    %122 = vector.load %arg1[%121, %c0_56, %c0_57] : memref<8x8x256xbf16, #tpu.memory_space<vmem>>, vector<1x8x256xbf16>
    %123 = vector.shape_cast %122 : vector<1x8x256xbf16> to vector<8x256xbf16>
    %124 = arith.extf %123 : vector<8x256xbf16> to vector<8x256xf32>
    %c0_58 = arith.constant 0 : index
    %c0_59 = arith.constant 0 : index
    %125 = vector.load %arg4[%c0_58, %c0_59] : memref<8x64xf32, #tpu.memory_space<vmem>>, vector<8x64xf32>
    %126 = arith.truncf %125 : vector<8x64xf32> to vector<8x64xbf16>
    %cst_60 = arith.constant dense<0.000000e+00> : vector<8x256xf32>
    %127 = tpu.matmul %126, %3, %cst_60 {dimension_numbers = #tpu.dot_dimension_numbers<[1], [0], [0], [1], [0, 0, 1, 1], [], []>} : vector<8x64xbf16>, vector<64x256xbf16>, vector<8x256xf32> -> vector<8x256xf32>
    %128 = arith.addf %124, %127 : vector<8x256xf32>
    %129 = arith.mulf %128, %12 : vector<8x256xf32>
    %130 = math.tanh %129 : vector<8x256xf32>
    %cst_61 = arith.constant 5.000000e-01 : f32
    %131 = vector.broadcast %cst_61 : f32 to vector<8x256xf32>
    %132 = arith.mulf %131, %130 : vector<8x256xf32>
    %cst_62 = arith.constant 5.000000e-01 : f32
    %133 = vector.broadcast %cst_62 : f32 to vector<8x256xf32>
    %134 = arith.addf %132, %133 : vector<8x256xf32>
    %135 = arith.select %9, %130, %134 : vector<8x256xi1>, vector<8x256xf32>
    %136 = vector.extract_strided_slice %135 {offsets = [0, 0], sizes = [8, 64], strides = [1, 1]} : vector<8x256xf32> to vector<8x64xf32>
    %137 = vector.extract_strided_slice %135 {offsets = [0, 64], sizes = [8, 64], strides = [1, 1]} : vector<8x256xf32> to vector<8x64xf32>
    %138 = vector.extract_strided_slice %135 {offsets = [0, 128], sizes = [8, 64], strides = [1, 1]} : vector<8x256xf32> to vector<8x64xf32>
    %139 = vector.extract_strided_slice %135 {offsets = [0, 192], sizes = [8, 64], strides = [1, 1]} : vector<8x256xf32> to vector<8x64xf32>
    %c0_63 = arith.constant 0 : index
    %c0_64 = arith.constant 0 : index
    %140 = vector.load %arg5[%c0_63, %c0_64] : memref<8x64xf32, #tpu.memory_space<vmem>>, vector<8x64xf32>
    %141 = arith.mulf %137, %140 : vector<8x64xf32>
    %142 = arith.mulf %136, %138 : vector<8x64xf32>
    %143 = arith.addf %141, %142 : vector<8x64xf32>
    %144 = math.tanh %143 : vector<8x64xf32>
    %145 = arith.mulf %139, %144 : vector<8x64xf32>
    %c0_65 = arith.constant 0 : index
    %c0_66 = arith.constant 0 : index
    %146 = vector.load %arg5[%c0_65, %c0_66] : memref<8x64xf32, #tpu.memory_space<vmem>>, vector<8x64xf32>
    tpu.vector_store %arg5[%c0_65, %c0_66], %143 {strides = array<i32>} : memref<8x64xf32, #tpu.memory_space<vmem>>, vector<8x64xf32>,
    %c0_67 = arith.constant 0 : index
    %c0_68 = arith.constant 0 : index
    %147 = vector.load %arg4[%c0_67, %c0_68] : memref<8x64xf32, #tpu.memory_space<vmem>>, vector<8x64xf32>
    tpu.vector_store %arg4[%c0_67, %c0_68], %145 {strides = array<i32>} : memref<8x64xf32, #tpu.memory_space<vmem>>, vector<8x64xf32>,
    %c5_i32 = arith.constant 5 : i32
    %148 = arith.index_cast %c5_i32 : i32 to index
    %c0_69 = arith.constant 0 : index
    %c0_70 = arith.constant 0 : index
    %149 = vector.load %arg1[%148, %c0_69, %c0_70] : memref<8x8x256xbf16, #tpu.memory_space<vmem>>, vector<1x8x256xbf16>
    %150 = vector.shape_cast %149 : vector<1x8x256xbf16> to vector<8x256xbf16>
    %151 = arith.extf %150 : vector<8x256xbf16> to vector<8x256xf32>
    %c0_71 = arith.constant 0 : index
    %c0_72 = arith.constant 0 : index
    %152 = vector.load %arg4[%c0_71, %c0_72] : memref<8x64xf32, #tpu.memory_space<vmem>>, vector<8x64xf32>
    %153 = arith.truncf %152 : vector<8x64xf32> to vector<8x64xbf16>
    %cst_73 = arith.constant dense<0.000000e+00> : vector<8x256xf32>
    %154 = tpu.matmul %153, %3, %cst_73 {dimension_numbers = #tpu.dot_dimension_numbers<[1], [0], [0], [1], [0, 0, 1, 1], [], []>} : vector<8x64xbf16>, vector<64x256xbf16>, vector<8x256xf32> -> vector<8x256xf32>
    %155 = arith.addf %151, %154 : vector<8x256xf32>
    %156 = arith.mulf %155, %12 : vector<8x256xf32>
    %157 = math.tanh %156 : vector<8x256xf32>
    %cst_74 = arith.constant 5.000000e-01 : f32
    %158 = vector.broadcast %cst_74 : f32 to vector<8x256xf32>
    %159 = arith.mulf %158, %157 : vector<8x256xf32>
    %cst_75 = arith.constant 5.000000e-01 : f32
    %160 = vector.broadcast %cst_75 : f32 to vector<8x256xf32>
    %161 = arith.addf %159, %160 : vector<8x256xf32>
    %162 = arith.select %9, %157, %161 : vector<8x256xi1>, vector<8x256xf32>
    %163 = vector.extract_strided_slice %162 {offsets = [0, 0], sizes = [8, 64], strides = [1, 1]} : vector<8x256xf32> to vector<8x64xf32>
    %164 = vector.extract_strided_slice %162 {offsets = [0, 64], sizes = [8, 64], strides = [1, 1]} : vector<8x256xf32> to vector<8x64xf32>
    %165 = vector.extract_strided_slice %162 {offsets = [0, 128], sizes = [8, 64], strides = [1, 1]} : vector<8x256xf32> to vector<8x64xf32>
    %166 = vector.extract_strided_slice %162 {offsets = [0, 192], sizes = [8, 64], strides = [1, 1]} : vector<8x256xf32> to vector<8x64xf32>
    %c0_76 = arith.constant 0 : index
    %c0_77 = arith.constant 0 : index
    %167 = vector.load %arg5[%c0_76, %c0_77] : memref<8x64xf32, #tpu.memory_space<vmem>>, vector<8x64xf32>
    %168 = arith.mulf %164, %167 : vector<8x64xf32>
    %169 = arith.mulf %163, %165 : vector<8x64xf32>
    %170 = arith.addf %168, %169 : vector<8x64xf32>
    %171 = math.tanh %170 : vector<8x64xf32>
    %172 = arith.mulf %166, %171 : vector<8x64xf32>
    %c0_78 = arith.constant 0 : index
    %c0_79 = arith.constant 0 : index
    %173 = vector.load %arg5[%c0_78, %c0_79] : memref<8x64xf32, #tpu.memory_space<vmem>>, vector<8x64xf32>
    tpu.vector_store %arg5[%c0_78, %c0_79], %170 {strides = array<i32>} : memref<8x64xf32, #tpu.memory_space<vmem>>, vector<8x64xf32>,
    %c0_80 = arith.constant 0 : index
    %c0_81 = arith.constant 0 : index
    %174 = vector.load %arg4[%c0_80, %c0_81] : memref<8x64xf32, #tpu.memory_space<vmem>>, vector<8x64xf32>
    tpu.vector_store %arg4[%c0_80, %c0_81], %172 {strides = array<i32>} : memref<8x64xf32, #tpu.memory_space<vmem>>, vector<8x64xf32>,
    %c6_i32 = arith.constant 6 : i32
    %175 = arith.index_cast %c6_i32 : i32 to index
    %c0_82 = arith.constant 0 : index
    %c0_83 = arith.constant 0 : index
    %176 = vector.load %arg1[%175, %c0_82, %c0_83] : memref<8x8x256xbf16, #tpu.memory_space<vmem>>, vector<1x8x256xbf16>
    %177 = vector.shape_cast %176 : vector<1x8x256xbf16> to vector<8x256xbf16>
    %178 = arith.extf %177 : vector<8x256xbf16> to vector<8x256xf32>
    %c0_84 = arith.constant 0 : index
    %c0_85 = arith.constant 0 : index
    %179 = vector.load %arg4[%c0_84, %c0_85] : memref<8x64xf32, #tpu.memory_space<vmem>>, vector<8x64xf32>
    %180 = arith.truncf %179 : vector<8x64xf32> to vector<8x64xbf16>
    %cst_86 = arith.constant dense<0.000000e+00> : vector<8x256xf32>
    %181 = tpu.matmul %180, %3, %cst_86 {dimension_numbers = #tpu.dot_dimension_numbers<[1], [0], [0], [1], [0, 0, 1, 1], [], []>} : vector<8x64xbf16>, vector<64x256xbf16>, vector<8x256xf32> -> vector<8x256xf32>
    %182 = arith.addf %178, %181 : vector<8x256xf32>
    %183 = arith.mulf %182, %12 : vector<8x256xf32>
    %184 = math.tanh %183 : vector<8x256xf32>
    %cst_87 = arith.constant 5.000000e-01 : f32
    %185 = vector.broadcast %cst_87 : f32 to vector<8x256xf32>
    %186 = arith.mulf %185, %184 : vector<8x256xf32>
    %cst_88 = arith.constant 5.000000e-01 : f32
    %187 = vector.broadcast %cst_88 : f32 to vector<8x256xf32>
    %188 = arith.addf %186, %187 : vector<8x256xf32>
    %189 = arith.select %9, %184, %188 : vector<8x256xi1>, vector<8x256xf32>
    %190 = vector.extract_strided_slice %189 {offsets = [0, 0], sizes = [8, 64], strides = [1, 1]} : vector<8x256xf32> to vector<8x64xf32>
    %191 = vector.extract_strided_slice %189 {offsets = [0, 64], sizes = [8, 64], strides = [1, 1]} : vector<8x256xf32> to vector<8x64xf32>
    %192 = vector.extract_strided_slice %189 {offsets = [0, 128], sizes = [8, 64], strides = [1, 1]} : vector<8x256xf32> to vector<8x64xf32>
    %193 = vector.extract_strided_slice %189 {offsets = [0, 192], sizes = [8, 64], strides = [1, 1]} : vector<8x256xf32> to vector<8x64xf32>
    %c0_89 = arith.constant 0 : index
    %c0_90 = arith.constant 0 : index
    %194 = vector.load %arg5[%c0_89, %c0_90] : memref<8x64xf32, #tpu.memory_space<vmem>>, vector<8x64xf32>
    %195 = arith.mulf %191, %194 : vector<8x64xf32>
    %196 = arith.mulf %190, %192 : vector<8x64xf32>
    %197 = arith.addf %195, %196 : vector<8x64xf32>
    %198 = math.tanh %197 : vector<8x64xf32>
    %199 = arith.mulf %193, %198 : vector<8x64xf32>
    %c0_91 = arith.constant 0 : index
    %c0_92 = arith.constant 0 : index
    %200 = vector.load %arg5[%c0_91, %c0_92] : memref<8x64xf32, #tpu.memory_space<vmem>>, vector<8x64xf32>
    tpu.vector_store %arg5[%c0_91, %c0_92], %197 {strides = array<i32>} : memref<8x64xf32, #tpu.memory_space<vmem>>, vector<8x64xf32>,
    %c0_93 = arith.constant 0 : index
    %c0_94 = arith.constant 0 : index
    %201 = vector.load %arg4[%c0_93, %c0_94] : memref<8x64xf32, #tpu.memory_space<vmem>>, vector<8x64xf32>
    tpu.vector_store %arg4[%c0_93, %c0_94], %199 {strides = array<i32>} : memref<8x64xf32, #tpu.memory_space<vmem>>, vector<8x64xf32>,
    %c7_i32 = arith.constant 7 : i32
    %202 = arith.index_cast %c7_i32 : i32 to index
    %c0_95 = arith.constant 0 : index
    %c0_96 = arith.constant 0 : index
    %203 = vector.load %arg1[%202, %c0_95, %c0_96] : memref<8x8x256xbf16, #tpu.memory_space<vmem>>, vector<1x8x256xbf16>
    %204 = vector.shape_cast %203 : vector<1x8x256xbf16> to vector<8x256xbf16>
    %205 = arith.extf %204 : vector<8x256xbf16> to vector<8x256xf32>
    %c0_97 = arith.constant 0 : index
    %c0_98 = arith.constant 0 : index
    %206 = vector.load %arg4[%c0_97, %c0_98] : memref<8x64xf32, #tpu.memory_space<vmem>>, vector<8x64xf32>
    %207 = arith.truncf %206 : vector<8x64xf32> to vector<8x64xbf16>
    %cst_99 = arith.constant dense<0.000000e+00> : vector<8x256xf32>
    %208 = tpu.matmul %207, %3, %cst_99 {dimension_numbers = #tpu.dot_dimension_numbers<[1], [0], [0], [1], [0, 0, 1, 1], [], []>} : vector<8x64xbf16>, vector<64x256xbf16>, vector<8x256xf32> -> vector<8x256xf32>
    %209 = arith.addf %205, %208 : vector<8x256xf32>
    %210 = arith.mulf %209, %12 : vector<8x256xf32>
    %211 = math.tanh %210 : vector<8x256xf32>
    %cst_100 = arith.constant 5.000000e-01 : f32
    %212 = vector.broadcast %cst_100 : f32 to vector<8x256xf32>
    %213 = arith.mulf %212, %211 : vector<8x256xf32>
    %cst_101 = arith.constant 5.000000e-01 : f32
    %214 = vector.broadcast %cst_101 : f32 to vector<8x256xf32>
    %215 = arith.addf %213, %214 : vector<8x256xf32>
    %216 = arith.select %9, %211, %215 : vector<8x256xi1>, vector<8x256xf32>
    %217 = vector.extract_strided_slice %216 {offsets = [0, 0], sizes = [8, 64], strides = [1, 1]} : vector<8x256xf32> to vector<8x64xf32>
    %218 = vector.extract_strided_slice %216 {offsets = [0, 64], sizes = [8, 64], strides = [1, 1]} : vector<8x256xf32> to vector<8x64xf32>
    %219 = vector.extract_strided_slice %216 {offsets = [0, 128], sizes = [8, 64], strides = [1, 1]} : vector<8x256xf32> to vector<8x64xf32>
    %220 = vector.extract_strided_slice %216 {offsets = [0, 192], sizes = [8, 64], strides = [1, 1]} : vector<8x256xf32> to vector<8x64xf32>
    %c0_102 = arith.constant 0 : index
    %c0_103 = arith.constant 0 : index
    %221 = vector.load %arg5[%c0_102, %c0_103] : memref<8x64xf32, #tpu.memory_space<vmem>>, vector<8x64xf32>
    %222 = arith.mulf %218, %221 : vector<8x64xf32>
    %223 = arith.mulf %217, %219 : vector<8x64xf32>
    %224 = arith.addf %222, %223 : vector<8x64xf32>
    %225 = math.tanh %224 : vector<8x64xf32>
    %226 = arith.mulf %220, %225 : vector<8x64xf32>
    %c0_104 = arith.constant 0 : index
    %c0_105 = arith.constant 0 : index
    %227 = vector.load %arg5[%c0_104, %c0_105] : memref<8x64xf32, #tpu.memory_space<vmem>>, vector<8x64xf32>
    tpu.vector_store %arg5[%c0_104, %c0_105], %224 {strides = array<i32>} : memref<8x64xf32, #tpu.memory_space<vmem>>, vector<8x64xf32>,
    %c0_106 = arith.constant 0 : index
    %c0_107 = arith.constant 0 : index
    %228 = vector.load %arg4[%c0_106, %c0_107] : memref<8x64xf32, #tpu.memory_space<vmem>>, vector<8x64xf32>
    tpu.vector_store %arg4[%c0_106, %c0_107], %226 {strides = array<i32>} : memref<8x64xf32, #tpu.memory_space<vmem>>, vector<8x64xf32>,
    %c8_i32 = arith.constant 8 : i32
    %c0_i32_108 = arith.constant 0 : i32
    %229 = arith.cmpi eq, %arg0, %c0_i32_108 : i32
    %230 = arith.extui %229 : i1 to i32
    %c0_i32_109 = arith.constant 0 : i32
    %231 = arith.cmpi ne, %230, %c0_i32_109 : i32
    scf.if %231 {
      %c0_110 = arith.constant 0 : index
      %c0_111 = arith.constant 0 : index
      %232 = vector.load %arg4[%c0_110, %c0_111] : memref<8x64xf32, #tpu.memory_space<vmem>>, vector<8x64xf32>
      %c0_112 = arith.constant 0 : index
      %c0_113 = arith.constant 0 : index
      %233 = vector.load %arg3[%c0_112, %c0_113] : memref<8x64xf32, #tpu.memory_space<vmem>>, vector<8x64xf32>
      tpu.vector_store %arg3[%c0_112, %c0_113], %232 {strides = array<i32>} : memref<8x64xf32, #tpu.memory_space<vmem>>, vector<8x64xf32>,
    } else {
    }
    return
  }
  func.func @transform_0(%arg0: i32) -> (i32, i32, i32) {
    %c0_i32 = arith.constant 0 : i32
    %c0_i32_0 = arith.constant 0 : i32
    %c0_i32_1 = arith.constant 0 : i32
    return %arg0, %c0_i32, %c0_i32_0 : i32, i32, i32
  }
  func.func @transform_1(%arg0: i32) -> (i32, i32) {
    %c0_i32 = arith.constant 0 : i32
    %c0_i32_0 = arith.constant 0 : i32
    %c0_i32_1 = arith.constant 0 : i32
    return %c0_i32, %c0_i32_0 : i32, i32
  }
  func.func @transform_2(%arg0: i32) -> (i32, i32) {
    %c0_i32 = arith.constant 0 : i32
    %c0_i32_0 = arith.constant 0 : i32
    %c0_i32_1 = arith.constant 0 : i32
    return %c0_i32, %c0_i32_0 : i32, i32
  }
}

</mosaic_0001>

<bundles_post_ra>
// kernel: tpu_custom_call.1
= control target key start
LH: loop header
LB: loop body
LE: loop exit
PB: predicated region body
PF: predicated region fallthrough
CT: control target
= control target key end

     0   :  { %7 = vsyncpa [#allocation5], 0  ;;  %s1102_s0 = inlined_call_operand.hbm [shape: bf16[8,8,256], index: 0, kind: input, shape index: {}]   ;;  %s1103_s1 = inlined_call_operand.hbm [shape: bf16[64,256], index: 1, kind: input, shape index: {}]   ;;  %s1104_s2 = inlined_call_operand.hbm [shape: f32[8,64], index: 2, kind: output, shape index: {}]  }
   0x1   :  { %8 = vsyncpa [#allocation8], 0 }
   0x2   :  { %9 = vsyncpa [#allocation6], 0  ;;  %s14_s11 = sshll.u32 %s1102_s0, 4  ;;  %s892_s12 = smov [#allocation4]   ;;  %s15_s11 = int_to_ptr.hbm [resolvable:$true] %s14_s11 }
   0x3   :  { %s16_s13 = sshll.u32 %s892_s12, 4  ;;  %s27_s16 = sshll.u32 %s1103_s1, 4  ;;  %s17_s13 = int_to_ptr.vmem [resolvable:$true] %s16_s13  ;;  %s28_s16 = int_to_ptr.hbm [resolvable:$true] %s27_s16 }
   0x4   :  { %s893_s17 = smov 128   ;;  %s894_s18 = smov 8  }
   0x5   :  { %22 = dma.hbm_to_vmem [thread:$0]  %s15_s11, 1024, %s17_s13, [#allocation5], %s893_s17, %s893_s17, %s894_s18  }
   0x6   :  { %s895_s19 = smov [#allocation7]  }
   0x7   :  { %s29_s20 = sshll.u32 %s895_s19, 4  ;;  %s30_s20 = int_to_ptr.vmem [resolvable:$true] %s29_s20 }
   0x8   :  { %35 = dma.hbm_to_vmem [thread:$0]  %s28_s16, 1024, %s30_s20, [#allocation8], %s893_s17, %s893_s17, %s894_s18  }
   0x9   :  { %886 = dma.done.wait [#allocation5], 1024  }
   0xa   :  { %887 = vsyncadd [#allocation5], 4294966272 }
   0xb   :  { %888 = dma.done.wait [#allocation8], 1024  }
   0xc   :  { %889 = vsyncadd [#allocation8], 4294966272  ;;  %vm49_vm0 = vcmask 523264   ;;  %v896_v0 = vmov 0.0   ;;  %v728_v1 = vld [vmem:[#allocation7 + $0x30] sm:$0xf]  ;;  %v60_v28 = vlaneseq }
   0xd   :  { %50 = vst.msk [vmem:[#allocation2] sm:$0xff] %vm49_vm0, %v896_v0  ;;  %v757_v2 = vld [vmem:[#allocation7 + $0x34] sm:$0xf0]  ;;  %v756_v3 = vld [vmem:[#allocation7 + $0x34] sm:$0xf]  ;;  %s897_s0 = smov 64  }
   0xe   :  { %51 = vst.msk [vmem:[#allocation3] sm:$0xff] %vm49_vm0, %v896_v0  ;;  %v923_v4 = vor.u32 %v757_v2, %v728_v1  ;;  %v730_v5 = vld [vmem:[#allocation7 + $0x38] sm:$0xf0]  ;;  %v720_v6 = vld [vmem:[#allocation7 + $0x20] sm:$0xf]  ;;  %v61_v29 = vand.u32 127, %v60_v28 }
   0xf   :  { %v755_v7 = vld [vmem:[#allocation7 + $0x24] sm:$0xf0]  ;;  %v925_v8 = vor.u32 %v756_v3, %v730_v5  ;;  %v754_v9 = vld [vmem:[#allocation7 + $0x24] sm:$0xf]  ;;  %v722_v10 = vld [vmem:[#allocation7 + $0x28] sm:$0xf0] }
  0x10   :  { %124 = vmatpush.bf16.msra.mxu0 %v923_v4  ;;  %v928_v11 = vor.u32 %v755_v7, %v720_v6  ;;  %195 = vmatpush.bf16.msra.mxu2 %v923_v4  ;;  %v932_v12 = vor.u32 %v754_v9, %v722_v10  ;;  %v712_v13 = vld [vmem:[#allocation7 + $0x10] sm:$0xf]  ;;  %v753_v14 = vld [vmem:[#allocation7 + $0x14] sm:$0xf0]  ;;  %v752_v15 = vld [vmem:[#allocation7 + $0x14] sm:$0xf] }
  0x11   :  { %137 = vmatpush.bf16.msra.mxu1 %v925_v8  ;;  %208 = vmatpush.bf16.msra.mxu3 %v925_v8  ;;  %v714_v16 = vld [vmem:[#allocation7 + $0x18] sm:$0xf0]  ;;  %v937_v18 = vor.u32 %v753_v14, %v712_v13  ;;  %v704_v20 = vld [vmem:[#allocation7] sm:$0xf]  ;;  %v751_v21 = vld [vmem:[#allocation7 + $0x4] sm:$0xf0] }
  0x12   :  { %v941_v19 = vor.u32 %v752_v15, %v714_v16  ;;  %v750_v22 = vld [vmem:[#allocation7 + $0x4] sm:$0xf]  ;;  %v706_v23 = vld [vmem:[#allocation7 + $0x8] sm:$0xf0]  ;;  %v945_v24 = vor.u32 %v751_v21, %v704_v20  ;;  %v982_v31 = vadd.s32 128, %v61_v29  ;;  %v898_v36 = vmov 0.5  }
  0x13   :  { %v949_v26 = vor.u32 %v750_v22, %v706_v23  ;;  %v71_v30 = vld [vmem:[#allocation4] sm:$0xff]  ;;  %v183_v63 = vld [vmem:[#allocation4 + $0x8] sm:$0xff]  ;;  %s899_s1 = smov [#allocation9]   ;;  %s691_s24 = sshll.u32 %s1104_s2, 4  ;;  %s692_s24 = int_to_ptr.hbm [resolvable:$true] %s691_s24 }
  0x14   :  { %125 = vmatpush.bf16.msra.mxu0 %v928_v11  ;;  %196 = vmatpush.bf16.msra.mxu2 %v928_v11  ;;  %v74_v25 = vld [vmem:[#allocation2] sm:$0xff]  ;;  %v72_v32 = vunpack.c.l.bf16 %v71_v30  ;;  %vm66_vm1 = vcmp.lt.s32.totalorder %v982_v31, 192  ;;  %v73_v33 = vunpack.c.h.bf16 %v71_v30  ;;  %v184_v0 = vunpack.c.l.bf16 %v183_v63  ;;  %s689_s21 = sshll.u32 %s899_s1, 4  ;;  %s690_s21 = int_to_ptr.vmem [resolvable:$true] %s689_s21 }
  0x15   :  { %v158_v17 = vld [vmem:[#allocation3] sm:$0xff]  ;;  %138 = vmatpush.bf16.msra.mxu1 %v932_v12  ;;  %209 = vmatpush.bf16.msra.mxu3 %v932_v12  ;;  %v75_v27 = vpack.c.bf16 %v74_v25, %v74_v25  ;;  %v987_v37 = vsel %vm66_vm1, 1.0, %v898_v36  ;;  %v185_v1 = vunpack.c.h.bf16 %v183_v63 }
  0x16   :  { %160 = vrot.lane.b32.xlu0 %v158_v17, %s897_s0 }
  0x18   :  { %126 = vmatpush.bf16.msra.mxu0 %v937_v18  ;;  %197 = vmatpush.bf16.msra.mxu2 %v937_v18 }
  0x19   :  { %139 = vmatpush.bf16.msra.mxu1 %v941_v19  ;;  %210 = vmatpush.bf16.msra.mxu3 %v941_v19 }
  0x1c   :  { %127 = vmatpush.bf16.msra.mxu0 %v945_v24  ;;  %198 = vmatpush.bf16.msra.mxu2 %v945_v24 }
  0x1d   :  { %140 = vmatpush.bf16.msra.mxu1 %v949_v26  ;;  %211 = vmatpush.bf16.msra.mxu3 %v949_v26 }
  0x1f   :  { %734 = vmatmul.msk.bf16.vlgmr.msra.gmra.mxu0 %vm49_vm0, %v75_v27 }
  0x20   :  { %266 = vmatpush.bf16.msrb.mxu0 %v923_v4  ;;  %735 = vmatmul.msk.bf16.vlgmr.msra.gmra.mxu1 %vm49_vm0, %v75_v27 }
  0x21   :  { %279 = vmatpush.bf16.msrb.mxu1 %v925_v8  ;;  %350 = vmatpush.bf16.msrb.mxu3 %v925_v8 }
  0x22   :  { %337 = vmatpush.bf16.msrb.mxu2 %v923_v4 }
  0x24   :  { %267 = vmatpush.bf16.msrb.mxu0 %v928_v11 }
  0x25   :  { %280 = vmatpush.bf16.msrb.mxu1 %v932_v12  ;;  %351 = vmatpush.bf16.msrb.mxu3 %v932_v12 }
  0x26   :  { %338 = vmatpush.bf16.msrb.mxu2 %v928_v11 }
  0x28   :  { %268 = vmatpush.bf16.msrb.mxu0 %v937_v18 }
  0x29   :  { %281 = vmatpush.bf16.msrb.mxu1 %v941_v19  ;;  %352 = vmatpush.bf16.msrb.mxu3 %v941_v19 }
  0x2a   :  { %339 = vmatpush.bf16.msrb.mxu2 %v937_v18 }
  0x2c   :  { %269 = vmatpush.bf16.msrb.mxu0 %v945_v24 }
  0x2d   :  { %282 = vmatpush.bf16.msrb.mxu1 %v949_v26  ;;  %353 = vmatpush.bf16.msrb.mxu3 %v949_v26 }
  0x2e   :  { %340 = vmatpush.bf16.msrb.mxu2 %v945_v24 }
  0x30   :  { %408 = vmatpush.bf16.msra.mxu0 %v923_v4 }
  0x31   :  { %421 = vmatpush.bf16.msra.mxu1 %v925_v8 }
  0x34   :  { %409 = vmatpush.bf16.msra.mxu0 %v928_v11 }
  0x35   :  { %422 = vmatpush.bf16.msra.mxu1 %v932_v12 }
  0x38   :  { %410 = vmatpush.bf16.msra.mxu0 %v937_v18 }
  0x39   :  { %423 = vmatpush.bf16.msra.mxu1 %v941_v19 }
  0x3c   :  { %411 = vmatpush.bf16.msra.mxu0 %v945_v24 }
  0x3d   :  { %424 = vmatpush.bf16.msra.mxu1 %v949_v26 }
  0x88   :  { %v161_v52 = vpop.permute.xlu0 %160 }
  0x9c   :  { %v129_v34 = vpop.f32.mrf.mxu0 }
  0x9d   :  { %v146_v35 = vadd.f32 %v129_v34, %v72_v32  ;;  %v142_v38 = vpop.f32.mrf.mxu1 }
  0x9e   :  { %v147_v39 = vadd.f32 %v142_v38, %v73_v33 }
  0x9f   :  { %v148_v40 = vmul.f32 0.5, %v146_v35 }
  0xa0   :  { %v149_v41 = vmul.f32 %v147_v39, %v987_v37  ;;  %v254_v39 = vld [vmem:[#allocation4 + $0x10] sm:$0xff] }
  0xa1   :  { %766 = vtanh.f32 %v148_v40  ;;  %v255_v40 = vunpack.c.l.bf16 %v254_v39 }
  0xa2   :  { %768 = vtanh.f32 %v149_v41  ;;  %v256_v41 = vunpack.c.h.bf16 %v254_v39 }
  0xa4   :  { %v131_v42 = vpop.f32.mrf.mxu0 }
  0xa5   :  { %v144_v43 = vpop.f32.mrf.mxu1 }
  0xa7   :  { %v767_v44 = vpop.eup %766 }
  0xa8   :  { %v769_v45 = vpop.eup %768  ;;  %v152_v46 = vmul.f32 0.5, %v767_v44 }
  0xa9   :  { %v153_v47 = vmul.f32 0.5, %v769_v45 }
  0xaa   :  { %v154_v48 = vadd.f32 0.5, %v152_v46 }
  0xab   :  { %v155_v49 = vadd.f32 0.5, %v153_v47 }
  0xac   :  { %v163_v53 = vmul.f32 %v161_v52, %v154_v48 }
  0xad   :  { %v157_v50 = vsel %vm66_vm1, %v769_v45, %v155_v49 }
  0xae   :  { %v164_v51 = vmul.f32 %v157_v50, %v154_v48 }
  0xb0   :  { %166 = vrot.lane.b32.xlu0 %v164_v51, %s897_s0 }
 0x122   :  { %v167_v54 = vpop.permute.xlu0 %166 }
 0x123   :  { %v169_v55 = vadd.f32 %v167_v54, %v163_v53 }
 0x125   :  { %770 = vtanh.f32 %v169_v55 }
 0x12b   :  { %v771_v56 = vpop.eup %770 }
 0x12c   :  { %v171_v57 = vmul.f32 %v771_v56, %v157_v50 }
 0x12e   :  { %178 = vrot.lane.b32.xlu1 %v171_v57, %s897_s0 }
 0x136   :  { %173 = vrot.lane.b32.xlu1 %v169_v55, %s897_s0 }
 0x1a0   :  { %v179_v58 = vpop.permute.xlu1 %178 }
 0x1a1   :  { %181 = vst.msk [vmem:[#allocation2] sm:$0xff] %vm49_vm0, %v179_v58 }
 0x1a8   :  { %v174_v59 = vpop.permute.xlu1 %173  ;;  %v186_v60 = vld [vmem:[#allocation2] sm:$0xff] }
 0x1a9   :  { %176 = vst.msk [vmem:[#allocation3] sm:$0xff] %vm49_vm0, %v174_v59  ;;  %v187_v61 = vpack.c.bf16 %v186_v60, %v186_v60 }
 0x1ab   :  { %736 = vmatmul.msk.bf16.vlgmr.msra.gmra.mxu2 %vm49_vm0, %v187_v61  ;;  %737 = vmatmul.msk.bf16.vlgmr.msra.gmra.mxu3 %vm49_vm0, %v187_v61 }
 0x1ac   :  { %492 = vmatpush.bf16.msra.mxu3 %v925_v8  ;;  %479 = vmatpush.bf16.msra.mxu2 %v923_v4 }
 0x1b0   :  { %v229_v62 = vld [vmem:[#allocation3] sm:$0xff]  ;;  %493 = vmatpush.bf16.msra.mxu3 %v932_v12  ;;  %480 = vmatpush.bf16.msra.mxu2 %v928_v11 }
 0x1b1   :  { %231 = vrot.lane.b32.xlu2 %v229_v62, %s897_s0 }
 0x1b4   :  { %494 = vmatpush.bf16.msra.mxu3 %v941_v19  ;;  %481 = vmatpush.bf16.msra.mxu2 %v937_v18 }
 0x1b8   :  { %495 = vmatpush.bf16.msra.mxu3 %v949_v26  ;;  %482 = vmatpush.bf16.msra.mxu2 %v945_v24 }
 0x20b   :  { %v232_v25 = vpop.permute.xlu2 %231 }
 0x22e   :  { %v200_v2 = vpop.f32.mrf.mxu2  ;;  %v213_v3 = vpop.f32.mrf.mxu3 }
 0x22f   :  { %v217_v5 = vadd.f32 %v200_v2, %v184_v0  ;;  %v218_v6 = vadd.f32 %v213_v3, %v185_v1 }
 0x231   :  { %v219_v7 = vmul.f32 0.5, %v217_v5  ;;  %v220_v9 = vmul.f32 %v218_v6, %v987_v37  ;;  %v325_v6 = vld [vmem:[#allocation4 + $0x18] sm:$0xff] }
 0x233   :  { %772 = vtanh.f32 %v219_v7  ;;  %v326_v7 = vunpack.c.l.bf16 %v325_v6 }
 0x234   :  { %774 = vtanh.f32 %v220_v9  ;;  %v327_v9 = vunpack.c.h.bf16 %v325_v6 }
 0x236   :  { %v202_v10 = vpop.f32.mrf.mxu2  ;;  %v215_v13 = vpop.f32.mrf.mxu3 }
 0x239   :  { %v773_v14 = vpop.eup %772 }
 0x23a   :  { %v775_v15 = vpop.eup %774  ;;  %v223_v16 = vmul.f32 0.5, %v773_v14 }
 0x23b   :  { %v224_v17 = vmul.f32 0.5, %v775_v15 }
 0x23c   :  { %v225_v20 = vadd.f32 0.5, %v223_v16 }
 0x23d   :  { %v226_v21 = vadd.f32 0.5, %v224_v17 }
 0x23e   :  { %v234_v27 = vmul.f32 %v232_v25, %v225_v20 }
 0x23f   :  { %v228_v22 = vsel %vm66_vm1, %v775_v15, %v226_v21 }
 0x240   :  { %v235_v23 = vmul.f32 %v228_v22, %v225_v20 }
 0x242   :  { %237 = vrot.lane.b32.xlu2 %v235_v23, %s897_s0 }
 0x29c   :  { %v238_v28 = vpop.permute.xlu2 %237 }
 0x29d   :  { %v240_v29 = vadd.f32 %v238_v28, %v234_v27 }
 0x29f   :  { %776 = vtanh.f32 %v240_v29  ;;  %244 = vrot.lane.b32.xlu1 %v240_v29, %s897_s0 }
 0x2a5   :  { %v777_v30 = vpop.eup %776 }
 0x2a6   :  { %v242_v32 = vmul.f32 %v777_v30, %v228_v22 }
 0x2a8   :  { %249 = vrot.lane.b32.xlu0 %v242_v32, %s897_s0 }
 0x311   :  { %v245_v33 = vpop.permute.xlu1 %244 }
 0x312   :  { %247 = vst.msk [vmem:[#allocation3] sm:$0xff] %vm49_vm0, %v245_v33 }
 0x319   :  { %v300_v34 = vld [vmem:[#allocation3] sm:$0xff] }
 0x31a   :  { %302 = vrot.lane.b32.xlu2 %v300_v34, %s897_s0  ;;  %v250_v35 = vpop.permute.xlu0 %249 }
 0x31b   :  { %252 = vst.msk [vmem:[#allocation2] sm:$0xff] %vm49_vm0, %v250_v35 }
 0x322   :  { %v257_v36 = vld [vmem:[#allocation2] sm:$0xff] }
 0x323   :  { %v258_v38 = vpack.c.bf16 %v257_v36, %v257_v36  ;;  %v396_v36 = vld [vmem:[#allocation4 + $0x20] sm:$0xff] }
 0x324   :  { %v398_v39 = vunpack.c.h.bf16 %v396_v36 }
 0x325   :  { %738 = vmatmul.msk.bf16.vlgmr.msrb.gmra.mxu0 %vm49_vm0, %v258_v38  ;;  %739 = vmatmul.msk.bf16.vlgmr.msrb.gmra.mxu1 %vm49_vm0, %v258_v38  ;;  %v397_v38 = vunpack.c.l.bf16 %v396_v36 }
 0x326   :  { %563 = vmatpush.bf16.msrb.mxu1 %v925_v8  ;;  %550 = vmatpush.bf16.msrb.mxu0 %v923_v4 }
 0x32a   :  { %564 = vmatpush.bf16.msrb.mxu1 %v932_v12  ;;  %551 = vmatpush.bf16.msrb.mxu0 %v928_v11 }
 0x32e   :  { %565 = vmatpush.bf16.msrb.mxu1 %v941_v19  ;;  %552 = vmatpush.bf16.msrb.mxu0 %v937_v18 }
 0x332   :  { %566 = vmatpush.bf16.msrb.mxu1 %v949_v26  ;;  %553 = vmatpush.bf16.msrb.mxu0 %v945_v24 }
 0x374   :  { %v303_v58 = vpop.permute.xlu2 %302 }
 0x3a2   :  { %v271_v42 = vpop.f32.mrf.mxu0  ;;  %v284_v43 = vpop.f32.mrf.mxu1 }
 0x3a3   :  { %v288_v44 = vadd.f32 %v271_v42, %v255_v40  ;;  %v289_v45 = vadd.f32 %v284_v43, %v256_v41 }
 0x3a5   :  { %v290_v46 = vmul.f32 0.5, %v288_v44  ;;  %v291_v47 = vmul.f32 %v289_v45, %v987_v37 }
 0x3a7   :  { %778 = vtanh.f32 %v290_v46 }
 0x3a8   :  { %780 = vtanh.f32 %v291_v47 }
 0x3aa   :  { %v273_v48 = vpop.f32.mrf.mxu0  ;;  %v286_v49 = vpop.f32.mrf.mxu1 }
 0x3ad   :  { %v779_v50 = vpop.eup %778 }
 0x3ae   :  { %v781_v51 = vpop.eup %780  ;;  %v294_v52 = vmul.f32 0.5, %v779_v50 }
 0x3af   :  { %v295_v53 = vmul.f32 0.5, %v781_v51 }
 0x3b0   :  { %v296_v54 = vadd.f32 0.5, %v294_v52 }
 0x3b1   :  { %v297_v55 = vadd.f32 0.5, %v295_v53 }
 0x3b2   :  { %v305_v59 = vmul.f32 %v303_v58, %v296_v54 }
 0x3b3   :  { %v299_v56 = vsel %vm66_vm1, %v781_v51, %v297_v55 }
 0x3b4   :  { %v306_v57 = vmul.f32 %v299_v56, %v296_v54 }
 0x3b6   :  { %308 = vrot.lane.b32.xlu0 %v306_v57, %s897_s0 }
 0x428   :  { %v309_v60 = vpop.permute.xlu0 %308 }
 0x429   :  { %v311_v61 = vadd.f32 %v309_v60, %v305_v59 }
 0x42b   :  { %782 = vtanh.f32 %v311_v61  ;;  %315 = vrot.lane.b32.xlu2 %v311_v61, %s897_s0 }
 0x431   :  { %v783_v62 = vpop.eup %782 }
 0x432   :  { %v313_v63 = vmul.f32 %v783_v62, %v299_v56 }
 0x434   :  { %320 = vrot.lane.b32.xlu1 %v313_v63, %s897_s0 }
 0x485   :  { %v316_v0 = vpop.permute.xlu2 %315 }
 0x486   :  { %318 = vst.msk [vmem:[#allocation3] sm:$0xff] %vm49_vm0, %v316_v0 }
 0x48d   :  { %v371_v1 = vld [vmem:[#allocation3] sm:$0xff] }
 0x48e   :  { %373 = vrot.lane.b32.xlu0 %v371_v1, %s897_s0 }
 0x4a6   :  { %v321_v2 = vpop.permute.xlu1 %320 }
 0x4a7   :  { %323 = vst.msk [vmem:[#allocation2] sm:$0xff] %vm49_vm0, %v321_v2 }
 0x4ae   :  { %v328_v3 = vld [vmem:[#allocation2] sm:$0xff] }
 0x4af   :  { %v329_v5 = vpack.c.bf16 %v328_v3, %v328_v3  ;;  %v467_v3 = vld [vmem:[#allocation4 + $0x28] sm:$0xff] }
 0x4b0   :  { %v469_v6 = vunpack.c.h.bf16 %v467_v3 }
 0x4b1   :  { %740 = vmatmul.msk.bf16.vlgmr.msrb.gmra.mxu2 %vm49_vm0, %v329_v5  ;;  %741 = vmatmul.msk.bf16.vlgmr.msrb.gmra.mxu3 %vm49_vm0, %v329_v5  ;;  %v468_v5 = vunpack.c.l.bf16 %v467_v3 }
 0x4b2   :  { %634 = vmatpush.bf16.msrb.mxu3 %v925_v8  ;;  %621 = vmatpush.bf16.msrb.mxu2 %v923_v4 }
 0x4b6   :  { %635 = vmatpush.bf16.msrb.mxu3 %v932_v12  ;;  %622 = vmatpush.bf16.msrb.mxu2 %v928_v11 }
 0x4ba   :  { %636 = vmatpush.bf16.msrb.mxu3 %v941_v19  ;;  %623 = vmatpush.bf16.msrb.mxu2 %v937_v18 }
 0x4be   :  { %637 = vmatpush.bf16.msrb.mxu3 %v949_v26  ;;  %624 = vmatpush.bf16.msrb.mxu2 %v945_v24 }
 0x500   :  { %v374_v22 = vpop.permute.xlu0 %373 }
 0x534   :  { %v342_v10 = vpop.f32.mrf.mxu2  ;;  %v355_v13 = vpop.f32.mrf.mxu3 }
 0x535   :  { %v359_v8 = vadd.f32 %v342_v10, %v326_v7  ;;  %v360_v14 = vadd.f32 %v355_v13, %v327_v9 }
 0x537   :  { %v361_v4 = vmul.f32 0.5, %v359_v8  ;;  %v362_v12 = vmul.f32 %v360_v14, %v987_v37 }
 0x539   :  { %784 = vtanh.f32 %v361_v4 }
 0x53a   :  { %786 = vtanh.f32 %v362_v12 }
 0x53c   :  { %v344_v11 = vpop.f32.mrf.mxu2  ;;  %v357_v19 = vpop.f32.mrf.mxu3 }
 0x53f   :  { %v785_v15 = vpop.eup %784 }
 0x540   :  { %v787_v18 = vpop.eup %786  ;;  %v365_v16 = vmul.f32 0.5, %v785_v15 }
 0x541   :  { %v366_v26 = vmul.f32 0.5, %v787_v18 }
 0x542   :  { %v367_v17 = vadd.f32 0.5, %v365_v16 }
 0x543   :  { %v368_v24 = vadd.f32 0.5, %v366_v26 }
 0x544   :  { %v376_v23 = vmul.f32 %v374_v22, %v367_v17 }
 0x545   :  { %v370_v20 = vsel %vm66_vm1, %v787_v18, %v368_v24 }
 0x546   :  { %v377_v21 = vmul.f32 %v370_v20, %v367_v17 }
 0x548   :  { %379 = vrot.lane.b32.xlu1 %v377_v21, %s897_s0 }
 0x5ba   :  { %v380_v25 = vpop.permute.xlu1 %379 }
 0x5bb   :  { %v382_v27 = vadd.f32 %v380_v25, %v376_v23 }
 0x5bd   :  { %788 = vtanh.f32 %v382_v27  ;;  %386 = vrot.lane.b32.xlu0 %v382_v27, %s897_s0 }
 0x5c3   :  { %v789_v28 = vpop.eup %788 }
 0x5c4   :  { %v384_v29 = vmul.f32 %v789_v28, %v370_v20 }
 0x5c6   :  { %391 = vrot.lane.b32.xlu2 %v384_v29, %s897_s0 }
 0x620   :  { %v392_v30 = vpop.permute.xlu2 %391 }
 0x621   :  { %394 = vst.msk [vmem:[#allocation2] sm:$0xff] %vm49_vm0, %v392_v30 }
 0x628   :  { %v399_v32 = vld [vmem:[#allocation2] sm:$0xff] }
 0x629   :  { %v400_v33 = vpack.c.bf16 %v399_v32, %v399_v32 }
 0x62b   :  { %742 = vmatmul.msk.bf16.vlgmr.msra.gmra.mxu0 %vm49_vm0, %v400_v33  ;;  %743 = vmatmul.msk.bf16.vlgmr.msra.gmra.mxu1 %vm49_vm0, %v400_v33 }
 0x62f   :  { %v387_v34 = vpop.permute.xlu0 %386 }
 0x630   :  { %389 = vst.msk [vmem:[#allocation3] sm:$0xff] %vm49_vm0, %v387_v34  ;;  %v538_v34 = vld [vmem:[#allocation4 + $0x30] sm:$0xff] }
 0x631   :  { %v540_v36 = vunpack.c.h.bf16 %v538_v34 }
 0x637   :  { %v442_v35 = vld [vmem:[#allocation3] sm:$0xff] }
 0x638   :  { %444 = vrot.lane.b32.xlu1 %v442_v35, %s897_s0  ;;  %v539_v35 = vunpack.c.l.bf16 %v538_v34 }
 0x6a8   :  { %v413_v40 = vpop.f32.mrf.mxu0  ;;  %v426_v41 = vpop.f32.mrf.mxu1 }
 0x6a9   :  { %v430_v42 = vadd.f32 %v413_v40, %v397_v38  ;;  %v431_v43 = vadd.f32 %v426_v41, %v398_v39 }
 0x6aa   :  { %v445_v56 = vpop.permute.xlu1 %444 }
 0x6ab   :  { %v432_v44 = vmul.f32 0.5, %v430_v42  ;;  %v433_v45 = vmul.f32 %v431_v43, %v987_v37 }
 0x6ad   :  { %790 = vtanh.f32 %v432_v44 }
 0x6ae   :  { %792 = vtanh.f32 %v433_v45 }
 0x6b0   :  { %v415_v46 = vpop.f32.mrf.mxu0  ;;  %v428_v47 = vpop.f32.mrf.mxu1 }
 0x6b3   :  { %v791_v48 = vpop.eup %790 }
 0x6b4   :  { %v793_v49 = vpop.eup %792  ;;  %v436_v50 = vmul.f32 0.5, %v791_v48 }
 0x6b5   :  { %v437_v51 = vmul.f32 0.5, %v793_v49 }
 0x6b6   :  { %v438_v52 = vadd.f32 0.5, %v436_v50 }
 0x6b7   :  { %v439_v53 = vadd.f32 0.5, %v437_v51 }
 0x6b8   :  { %v447_v57 = vmul.f32 %v445_v56, %v438_v52 }
 0x6b9   :  { %v441_v54 = vsel %vm66_vm1, %v793_v49, %v439_v53 }
 0x6ba   :  { %v448_v55 = vmul.f32 %v441_v54, %v438_v52 }
 0x6bc   :  { %450 = vrot.lane.b32.xlu2 %v448_v55, %s897_s0 }
 0x716   :  { %v451_v58 = vpop.permute.xlu2 %450 }
 0x717   :  { %v453_v59 = vadd.f32 %v451_v58, %v447_v57 }
 0x719   :  { %794 = vtanh.f32 %v453_v59  ;;  %457 = vrot.lane.b32.xlu1 %v453_v59, %s897_s0 }
 0x71f   :  { %v795_v60 = vpop.eup %794 }
 0x720   :  { %v455_v61 = vmul.f32 %v795_v60, %v441_v54 }
 0x722   :  { %462 = vrot.lane.b32.xlu0 %v455_v61, %s897_s0 }
 0x78b   :  { %v458_v62 = vpop.permute.xlu1 %457 }
 0x78c   :  { %460 = vst.msk [vmem:[#allocation3] sm:$0xff] %vm49_vm0, %v458_v62 }
 0x793   :  { %v513_v63 = vld [vmem:[#allocation3] sm:$0xff] }
 0x794   :  { %515 = vrot.lane.b32.xlu2 %v513_v63, %s897_s0  ;;  %v463_v0 = vpop.permute.xlu0 %462 }
 0x795   :  { %465 = vst.msk [vmem:[#allocation2] sm:$0xff] %vm49_vm0, %v463_v0 }
 0x79c   :  { %v470_v1 = vld [vmem:[#allocation2] sm:$0xff] }
 0x79d   :  { %v471_v2 = vpack.c.bf16 %v470_v1, %v470_v1  ;;  %v609_v1 = vld [vmem:[#allocation4 + $0x38] sm:$0xff] }
 0x79e   :  { %v611_v3 = vunpack.c.h.bf16 %v609_v1 }
 0x79f   :  { %744 = vmatmul.msk.bf16.vlgmr.msra.gmra.mxu2 %vm49_vm0, %v471_v2  ;;  %745 = vmatmul.msk.bf16.vlgmr.msra.gmra.mxu3 %vm49_vm0, %v471_v2  ;;  %v610_v2 = vunpack.c.l.bf16 %v609_v1 }
 0x7ee   :  { %v516_v20 = vpop.permute.xlu2 %515 }
 0x822   :  { %v484_v7 = vpop.f32.mrf.mxu2  ;;  %v497_v9 = vpop.f32.mrf.mxu3 }
 0x823   :  { %v501_v10 = vadd.f32 %v484_v7, %v468_v5  ;;  %v502_v13 = vadd.f32 %v497_v9, %v469_v6 }
 0x825   :  { %v503_v8 = vmul.f32 0.5, %v501_v10  ;;  %v504_v14 = vmul.f32 %v502_v13, %v987_v37 }
 0x827   :  { %796 = vtanh.f32 %v503_v8 }
 0x828   :  { %798 = vtanh.f32 %v504_v14 }
 0x82a   :  { %v486_v4 = vpop.f32.mrf.mxu2  ;;  %v499_v12 = vpop.f32.mrf.mxu3 }
 0x82d   :  { %v797_v11 = vpop.eup %796 }
 0x82e   :  { %v799_v19 = vpop.eup %798  ;;  %v507_v15 = vmul.f32 0.5, %v797_v11 }
 0x82f   :  { %v508_v18 = vmul.f32 0.5, %v799_v19 }
 0x830   :  { %v509_v16 = vadd.f32 0.5, %v507_v15 }
 0x831   :  { %v510_v26 = vadd.f32 0.5, %v508_v18 }
 0x832   :  { %v518_v21 = vmul.f32 %v516_v20, %v509_v16 }
 0x833   :  { %v512_v17 = vsel %vm66_vm1, %v799_v19, %v510_v26 }
 0x834   :  { %v519_v24 = vmul.f32 %v512_v17, %v509_v16 }
 0x836   :  { %521 = vrot.lane.b32.xlu0 %v519_v24, %s897_s0 }
 0x8a8   :  { %v522_v22 = vpop.permute.xlu0 %521 }
 0x8a9   :  { %v524_v23 = vadd.f32 %v522_v22, %v518_v21 }
 0x8ab   :  { %800 = vtanh.f32 %v524_v23  ;;  %528 = vrot.lane.b32.xlu2 %v524_v23, %s897_s0 }
 0x8b1   :  { %v801_v25 = vpop.eup %800 }
 0x8b2   :  { %v526_v27 = vmul.f32 %v801_v25, %v512_v17 }
 0x8b4   :  { %533 = vrot.lane.b32.xlu1 %v526_v27, %s897_s0 }
 0x905   :  { %v529_v28 = vpop.permute.xlu2 %528 }
 0x906   :  { %531 = vst.msk [vmem:[#allocation3] sm:$0xff] %vm49_vm0, %v529_v28 }
 0x90d   :  { %v584_v29 = vld [vmem:[#allocation3] sm:$0xff] }
 0x90e   :  { %586 = vrot.lane.b32.xlu0 %v584_v29, %s897_s0 }
 0x926   :  { %v534_v30 = vpop.permute.xlu1 %533 }
 0x927   :  { %536 = vst.msk [vmem:[#allocation2] sm:$0xff] %vm49_vm0, %v534_v30 }
 0x92e   :  { %v541_v32 = vld [vmem:[#allocation2] sm:$0xff] }
 0x92f   :  { %v542_v33 = vpack.c.bf16 %v541_v32, %v541_v32 }
 0x931   :  { %746 = vmatmul.msk.bf16.vlgmr.msrb.gmra.mxu0 %vm49_vm0, %v542_v33  ;;  %747 = vmatmul.msk.bf16.vlgmr.msrb.gmra.mxu1 %vm49_vm0, %v542_v33 }
 0x980   :  { %v587_v54 = vpop.permute.xlu0 %586 }
 0x9ae   :  { %v555_v38 = vpop.f32.mrf.mxu0  ;;  %v568_v39 = vpop.f32.mrf.mxu1 }
 0x9af   :  { %v572_v40 = vadd.f32 %v555_v38, %v539_v35  ;;  %v573_v41 = vadd.f32 %v568_v39, %v540_v36 }
 0x9b1   :  { %v574_v42 = vmul.f32 0.5, %v572_v40  ;;  %v575_v43 = vmul.f32 %v573_v41, %v987_v37 }
 0x9b3   :  { %802 = vtanh.f32 %v574_v42 }
 0x9b4   :  { %804 = vtanh.f32 %v575_v43 }
 0x9b6   :  { %v557_v44 = vpop.f32.mrf.mxu0  ;;  %v570_v45 = vpop.f32.mrf.mxu1 }
 0x9b9   :  { %v803_v46 = vpop.eup %802 }
 0x9ba   :  { %v805_v47 = vpop.eup %804  ;;  %v578_v48 = vmul.f32 0.5, %v803_v46 }
 0x9bb   :  { %v579_v49 = vmul.f32 0.5, %v805_v47 }
 0x9bc   :  { %v580_v50 = vadd.f32 0.5, %v578_v48 }
 0x9bd   :  { %v581_v51 = vadd.f32 0.5, %v579_v49 }
 0x9be   :  { %v589_v55 = vmul.f32 %v587_v54, %v580_v50 }
 0x9bf   :  { %v583_v52 = vsel %vm66_vm1, %v805_v47, %v581_v51 }
 0x9c0   :  { %v590_v53 = vmul.f32 %v583_v52, %v580_v50 }
 0x9c2   :  { %592 = vrot.lane.b32.xlu1 %v590_v53, %s897_s0 }
 0xa34   :  { %v593_v56 = vpop.permute.xlu1 %592 }
 0xa35   :  { %v595_v57 = vadd.f32 %v593_v56, %v589_v55 }
 0xa37   :  { %806 = vtanh.f32 %v595_v57  ;;  %599 = vrot.lane.b32.xlu0 %v595_v57, %s897_s0 }
 0xa3d   :  { %v807_v58 = vpop.eup %806 }
 0xa3e   :  { %v597_v59 = vmul.f32 %v807_v58, %v583_v52 }
 0xa40   :  { %604 = vrot.lane.b32.xlu2 %v597_v59, %s897_s0 }
 0xa9a   :  { %v605_v60 = vpop.permute.xlu2 %604 }
 0xa9b   :  { %607 = vst.msk [vmem:[#allocation2] sm:$0xff] %vm49_vm0, %v605_v60 }
 0xaa2   :  { %v612_v61 = vld [vmem:[#allocation2] sm:$0xff] }
 0xaa3   :  { %v613_v62 = vpack.c.bf16 %v612_v61, %v612_v61 }
 0xaa5   :  { %748 = vmatmul.msk.bf16.vlgmr.msrb.gmra.mxu2 %vm49_vm0, %v613_v62  ;;  %749 = vmatmul.msk.bf16.vlgmr.msrb.gmra.mxu3 %vm49_vm0, %v613_v62 }
 0xaa9   :  { %v600_v63 = vpop.permute.xlu0 %599 }
 0xaaa   :  { %602 = vst.msk [vmem:[#allocation3] sm:$0xff] %vm49_vm0, %v600_v63 }
 0xab1   :  { %v655_v0 = vld [vmem:[#allocation3] sm:$0xff] }
 0xab2   :  { %657 = vrot.lane.b32.xlu1 %v655_v0, %s897_s0 }
 0xb24   :  { %v658_v17 = vpop.permute.xlu1 %657 }
 0xb28   :  { %v626_v5 = vpop.f32.mrf.mxu2  ;;  %v639_v6 = vpop.f32.mrf.mxu3 }
 0xb29   :  { %v643_v7 = vadd.f32 %v626_v5, %v610_v2  ;;  %v644_v9 = vadd.f32 %v639_v6, %v611_v3 }
 0xb2b   :  { %v645_v10 = vmul.f32 0.5, %v643_v7  ;;  %v646_v13 = vmul.f32 %v644_v9, %v987_v37 }
 0xb2d   :  { %808 = vtanh.f32 %v645_v10 }
 0xb2e   :  { %810 = vtanh.f32 %v646_v13 }
 0xb30   :  { %v628_v8 = vpop.f32.mrf.mxu2  ;;  %v641_v14 = vpop.f32.mrf.mxu3 }
 0xb33   :  { %v809_v4 = vpop.eup %808 }
 0xb34   :  { %v811_v12 = vpop.eup %810  ;;  %v649_v11 = vmul.f32 0.5, %v809_v4 }
 0xb35   :  { %v650_v19 = vmul.f32 0.5, %v811_v12 }
 0xb36   :  { %v651_v15 = vadd.f32 0.5, %v649_v11 }
 0xb37   :  { %v652_v18 = vadd.f32 0.5, %v650_v19 }
 0xb38   :  { %v660_v24 = vmul.f32 %v658_v17, %v651_v15 }
 0xb39   :  { %v654_v16 = vsel %vm66_vm1, %v811_v12, %v652_v18 }
 0xb3a   :  { %v661_v26 = vmul.f32 %v654_v16, %v651_v15 }
 0xb3c   :  { %663 = vrot.lane.b32.xlu2 %v661_v26, %s897_s0 }
 0xb96   :  { %v664_v20 = vpop.permute.xlu2 %663 }
 0xb97   :  { %v666_v37 = vadd.f32 %v664_v20, %v660_v24 }
 0xb99   :  { %812 = vtanh.f32 %v666_v37  ;;  %670 = vrot.lane.b32.xlu1 %v666_v37, %s897_s0 }
 0xb9f   :  { %v813_v21 = vpop.eup %812 }
 0xba0   :  { %v668_v22 = vmul.f32 %v813_v21, %v654_v16 }
 0xba2   :  { %675 = vrot.lane.b32.xlu0 %v668_v22, %s897_s0 }
 0xc0b   :  { %v671_v23 = vpop.permute.xlu1 %670 }
 0xc0c   :  { %673 = vst.msk [vmem:[#allocation3] sm:$0xff] %vm49_vm0, %v671_v23 }
 0xc14   :  { %v676_v25 = vpop.permute.xlu0 %675 }
 0xc15   :  { %678 = vst.msk [vmem:[#allocation2] sm:$0xff] %vm49_vm0, %v676_v25 }
 0xc1c   :  { %v682_v31 = vld [vmem:[#allocation2] sm:$0xff] }
 0xc1d   :  { %683 = vst.msk [vmem:[#allocation9] sm:$0xff] %vm49_vm0, %v682_v31 }
 0xc1e   :  { %694 = dma.vmem_to_hbm [thread:$0]  %s690_s21, 128, %s692_s24, [#allocation6]  }
 0xc1f   :  { %890 = dma.done.wait [#allocation6], 128  }
 0xc20   :  { %891 = vsyncadd [#allocation6], 4294967168 }
 0xc21   :  { %699 = vsyncpa [#allocation5], 1 }
 0xc22   :  { %700 = vsyncpa [#allocation8], 1 }
 0xc23   :  { %701 = vsyncpa [#allocation6], 1 }

</bundles_post_ra>
